<compile_context>
chip_gen: v7x
topology: tpu7x:2x2x1
jax: 0.10.0
libtpu: 0.0.40
codegen_flags: <defaults>
</compile_context>

<pallas_src>
import functools

import jax
import jax.numpy as jnp
from jax.experimental import pallas as pl
from jax.experimental.pallas import tpu as pltpu


_TN_TARGET = 512          # output-lane tile target (sweepable 256-1024)
_TK_TARGET = 1024         # fewer, fatter K steps (amortize acc RMW + step overhead)
_VMEM_BUDGET = 28 << 20   # operand-buffer estimate kept under this
_VMEM_LIMIT = 48 << 20    # > v5e/v6e scoped defaults, < v7x 64 MiB physical


def _cdiv(a: int, b: int) -> int:
    return -(-a // b)


def _round_up(x: int, m: int) -> int:
    return _cdiv(x, m) * m


def _plan_kn(cin: int, cout: int):
    """Tile/padding plan for K (=Cin) and N (=Cout).

    Depends only on (cin, cout) so weights/bias can be pre-padded once in
    prepare_params() and reused by every mlp_forward() call.
    """
    np0 = _round_up(cout, 128)
    gn = _cdiv(np0, _TN_TARGET)
    if gn == 1 and np0 >= 256:
        gn = 2                       # >= 2 N blocks so v7x's two TCs both get work
    tn = _round_up(_cdiv(np0, gn), 128)
    npad = tn * gn

    kp0 = _round_up(cin, 128)
    if kp0 <= _TK_TARGET:
        gk, tk, kpad = 1, cin, cin   # single full-extent K block: no K padding at all
    else:
        gk = _cdiv(kp0, _TK_TARGET)
        tk = _round_up(_cdiv(kp0, gk), 128)
        kpad = tk * gk
    return tk, gk, kpad, tn, gn, npad


def _plan_m(batch: int, tk: int, tn: int, x_isz: int, w_isz: int, out_isz: int,
            use_scratch: bool):
    """Pick the M tile: whole (8-rounded) batch if it fits the VMEM budget."""
    bp0 = _round_up(batch, 8)
    fixed = 2 * tk * tn * w_isz + 2 * tn * 4           # W (double-buffered) + bias
    per_row = 2 * tk * x_isz + 2 * tn * out_isz        # x + out, double-buffered
    if use_scratch:
        per_row += tn * 4                               # f32 accumulator scratch
    tm_max = max(8, ((_VMEM_BUDGET - fixed) // per_row) // 8 * 8)
    tm = min(bp0, tm_max)
    gm = _cdiv(bp0, tm)
    tm = _round_up(_cdiv(bp0, gm), 8)                   # balance tiles; extra pad < gm*8
    return tm, gm, tm * gm


def _mlp_kernel(x_ref, w_ref, b_ref, o_ref, *scratch, relu: bool, activation: bool):
    # With no scratch (f32 output) the output tile itself is the accumulator:
    # its block index ignores k, so it stays resident in VMEM across the K loop.
    acc_ref = scratch[0] if scratch else o_ref
    k = pl.program_id(2)

    @pl.when(k == 0)
    def _():
        acc_ref[...] = jnp.zeros_like(acc_ref)

    # MXU matmul on the current (tm, tk) x (tk, tn) tiles, f32 accumulation.
    acc_ref[...] += jnp.dot(x_ref[...], w_ref[...],
                            preferred_element_type=jnp.float32)

    # Epilogue only on the final K step: bias + activation + cast + store.
    @pl.when(k == pl.num_programs(2) - 1)
    def _():
        y = acc_ref[...].astype(jnp.float32) + b_ref[...]
        if activation:
            y = jnp.maximum(y, 0.0) if relu else jax.nn.sigmoid(y)
        o_ref[...] = y.astype(o_ref.dtype)


def prepare_params(weight, bias, *, mxu_dtype=None):
    """Pad W -> (Kp, Np) and b -> (1, Np) ONCE (hoisted out of the per-call path).

    weight: (Cin, Cout) (transposed vs. PyTorch's (out, in)); bias: (Cout,).
    If mxu_dtype (e.g. jnp.bfloat16) is given, the weight is cast once here.
    """
    cin, cout = weight.shape
    _, _, kp, _, _, npad = _plan_kn(cin, cout)
    w = weight
    if (kp, npad) != (cin, cout):
        w = jnp.pad(w, ((0, kp - cin), (0, npad - cout)))
    if mxu_dtype is not None:
        w = w.astype(mxu_dtype)
    b = bias if npad == cout else jnp.pad(bias, (0, npad - cout))
    b = b.reshape(1, npad).astype(jnp.float32)
    return w, b, cout


def mlp_forward(x, w_padded, b_padded, cout, *, relu=True, activation=True,
                mxu_dtype=None):
    """y = act(x @ W + b).  w_padded/b_padded come from prepare_params()."""
    lead_shape = x.shape[:-1]
    cin = x.shape[-1]
    x2d = x.reshape(-1, cin)
    batch = x2d.shape[0]

    tk, gk, kp, tn, gn, npad = _plan_kn(cin, cout)
    assert w_padded.shape == (kp, npad) and b_padded.shape == (1, npad), (
        "params were not prepared for this (Cin, Cout)")

    out_dtype = x.dtype
    use_scratch = jnp.dtype(out_dtype) != jnp.dtype(jnp.float32)
    x_isz = jnp.dtype(mxu_dtype if mxu_dtype is not None else x.dtype).itemsize
    w_isz = jnp.dtype(w_padded.dtype).itemsize
    out_isz = jnp.dtype(out_dtype).itemsize

    tm, gm, bp = _plan_m(batch, tk, tn, x_isz, w_isz, out_isz, use_scratch)

    xp = x2d
    if (bp, kp) != (batch, cin):
        xp = jnp.pad(xp, ((0, bp - batch), (0, kp - cin)))
    if mxu_dtype is not None and xp.dtype != jnp.dtype(mxu_dtype):
        xp = xp.astype(mxu_dtype)

    grid = (gm, gn, gk)
    kernel = functools.partial(_mlp_kernel, relu=relu, activation=activation)
    scratch_shapes = [pltpu.VMEM((tm, tn), jnp.float32)] if use_scratch else []

    # HBM traffic including re-reads: x is read gn times, W gm times.
    bytes_accessed = (gn * bp * kp * x_isz + gm * kp * npad * w_isz
                      + gm * npad * 4 + bp * npad * out_isz)
    cost = pl.CostEstimate(
        flops=2 * bp * kp * npad,
        transcendentals=(bp * npad if (activation and not relu) else 0),
        bytes_accessed=bytes_accessed,
    )

    out = pl.pallas_call(
        kernel,
        out_shape=jax.ShapeDtypeStruct((bp, npad), out_dtype),
        grid_spec=pltpu.PrefetchScalarGridSpec(
            num_scalar_prefetch=0,
            grid=grid,
            in_specs=[
                pl.BlockSpec((tm, tk), lambda i, j, k: (i, k)),   # x tile
                pl.BlockSpec((tk, tn), lambda i, j, k: (k, j)),   # W tile
                pl.BlockSpec((1, tn), lambda i, j, k: (0, j)),    # bias tile
            ],
            out_specs=pl.BlockSpec((tm, tn), lambda i, j, k: (i, j)),
            scratch_shapes=scratch_shapes,
        ),
        compiler_params=pltpu.CompilerParams(
            dimension_semantics=("parallel", "parallel", "arbitrary"),
            vmem_limit_bytes=_VMEM_LIMIT,
        ),
        cost_estimate=cost,
        # TODO(synk): add pipeline_mode=pl.Buffered(3) on x/W specs only if a
        # profile shows exposed W-tile DMA near the compute/DMA crossover.
    )(xp, w_padded, b_padded)

    if (bp, npad) != (batch, cout):
        out = out[:batch, :cout]
    return out.reshape(*lead_shape, cout)


def init_mlp_params(key, input_channels, output_channels, dtype=jnp.float32):
    # Mirrors torch.nn.Linear default init: U(-1/sqrt(in), 1/sqrt(in)) for W and b.
    kw, kb = jax.random.split(key)
    bound = 1.0 / (input_channels ** 0.5)
    # PyTorch stores weight as (out, in); we keep it transposed as (in, out).
    w = jax.random.uniform(kw, (input_channels, output_channels),
                           minval=-bound, maxval=bound, dtype=dtype)
    b = jax.random.uniform(kb, (output_channels,),
                           minval=-bound, maxval=bound, dtype=dtype)
    return w, b


def _ref(x, w, b, relu, activation):
    y = x @ w + b
    if activation:
        y = jnp.maximum(y, 0.0) if relu else jax.nn.sigmoid(y)
    return y


if __name__ == "__main__":
    key = jax.random.PRNGKey(0)
    kx, kp, kx2, kp2 = jax.random.split(key, 4)

    ok = True

    # Small shapes matching the module's forward (Linear on channel-last input).
    batch, cin, cout = 8, 32, 16
    x = jax.random.normal(kx, (batch, cin), dtype=jnp.float32)
    w, b = init_mlp_params(kp, cin, cout)
    wp, bp_, _ = prepare_params(w, b)   # pad once, reuse for every variant below

    # Default MLP(input_channels, output_channels): Linear + ReLU
    y = mlp_forward(x, wp, bp_, cout, relu=True, activation=True)
    jax.block_until_ready(y)
    ok &= y.shape == (batch, cout)
    ok &= bool(jnp.allclose(y, _ref(x, w, b, True, True), atol=1e-5))

    # Sigmoid and no-activation variants.
    y_sig = mlp_forward(x, wp, bp_, cout, relu=False, activation=True)
    ok &= bool(jnp.allclose(y_sig, _ref(x, w, b, False, True), atol=1e-5))
    y_lin = mlp_forward(x, wp, bp_, cout, relu=True, activation=False)
    ok &= bool(jnp.allclose(y_lin, _ref(x, w, b, True, False), atol=1e-5))

    # Larger, non-aligned shape: exercises 8/128-only padding (304 x 640 x 256),
    # a single unpadded full-extent K block (tk = Cin = 640), a whole-batch M
    # tile (W streams from HBM once), and gn = 2 (v7x megacore sharding).
    B2, Cin2, Cout2 = 300, 640, 200
    x2 = jax.random.normal(kx2, (B2, Cin2), dtype=jnp.float32)
    w2, b2 = init_mlp_params(kp2, Cin2, Cout2)
    wp2, bp2, _ = prepare_params(w2, b2)
    y2 = mlp_forward(x2, wp2, bp2, Cout2, relu=True, activation=True)
    jax.block_until_ready(y2)
    ok &= y2.shape == (B2, Cout2)
    ok &= bool(jnp.allclose(y2, _ref(x2, w2, b2, True, True), atol=1e-4, rtol=1e-4))

    # bf16 MXU inputs + f32 accumulation (v6e/v7x fast path); looser tolerance.
    wp2b, bp2b, _ = prepare_params(w2, b2, mxu_dtype=jnp.bfloat16)
    y2b = mlp_forward(x2, wp2b, bp2b, Cout2, relu=True, activation=True,
                      mxu_dtype=jnp.bfloat16)
    jax.block_until_ready(y2b)
    ok &= y2b.shape == (B2, Cout2)
    ok &= bool(jnp.allclose(y2b, _ref(x2, w2, b2, True, True), atol=5e-2, rtol=5e-2))

    assert ok, "mismatch vs reference"
    print("KERNEL_OK")
</pallas_src>

<mosaic_0001>
module attributes {stable_mosaic.version = 11 : i64} {
  func.func @_mlp_kernel(%arg0: i32, %arg1: i32, %arg2: i32, %arg3: memref<8x32xf32, #tpu.memory_space<vmem>>, %arg4: memref<32x128xf32, #tpu.memory_space<vmem>>, %arg5: memref<1x128xf32, #tpu.memory_space<vmem>>, %arg6: memref<8x128xf32, #tpu.memory_space<vmem>>) attributes {dimension_semantics = [#tpu.dimension_semantics<parallel>, #tpu.dimension_semantics<parallel>, #tpu.dimension_semantics<arbitrary>], iteration_bounds = array<i64: 1, 1, 1>, scalar_prefetch = 0 : i64, scratch_operands = 0 : i64, tpu.core_type = #tpu.core_type<tc>, window_params = [{transform_indices = @transform_0, window_bounds = array<i64: 8, 32>}, {transform_indices = @transform_1, window_bounds = array<i64: 32, 128>}, {transform_indices = @transform_2, window_bounds = array<i64: 1, 128>}, {transform_indices = @transform_3, window_bounds = array<i64: 8, 128>}]} {
    %c0_i32 = arith.constant 0 : i32
    %0 = arith.cmpi eq, %arg2, %c0_i32 : i32
    %1 = arith.extui %0 : i1 to i32
    %c0_i32_0 = arith.constant 0 : i32
    %2 = arith.cmpi ne, %1, %c0_i32_0 : i32
    scf.if %2 {
      %cst_10 = arith.constant 0.000000e+00 : f32
      %12 = vector.broadcast %cst_10 : f32 to vector<8x128xf32>
      %c0_11 = arith.constant 0 : index
      %c0_12 = arith.constant 0 : index
      %13 = vector.load %arg6[%c0_11, %c0_12] : memref<8x128xf32, #tpu.memory_space<vmem>>, vector<8x128xf32>
      tpu.vector_store %arg6[%c0_11, %c0_12], %12 {strides = array<i32>} : memref<8x128xf32, #tpu.memory_space<vmem>>, vector<8x128xf32>,
    } else {
    }
    %c0 = arith.constant 0 : index
    %c0_1 = arith.constant 0 : index
    %3 = vector.load %arg6[%c0, %c0_1] : memref<8x128xf32, #tpu.memory_space<vmem>>, vector<8x128xf32>
    %c0_2 = arith.constant 0 : index
    %c0_3 = arith.constant 0 : index
    %4 = vector.load %arg3[%c0_2, %c0_3] : memref<8x32xf32, #tpu.memory_space<vmem>>, vector<8x32xf32>
    %c0_4 = arith.constant 0 : index
    %c0_5 = arith.constant 0 : index
    %5 = vector.load %arg4[%c0_4, %c0_5] : memref<32x128xf32, #tpu.memory_space<vmem>>, vector<32x128xf32>
    %cst = arith.constant dense<0.000000e+00> : vector<8x128xf32>
    %6 = tpu.matmul %4, %5, %cst {dimension_numbers = #tpu.dot_dimension_numbers<[1], [0], [0], [1], [0, 0, 1, 1], [], []>} : vector<8x32xf32>, vector<32x128xf32>, vector<8x128xf32> -> vector<8x128xf32>
    %7 = arith.addf %3, %6 : vector<8x128xf32>
    %c0_6 = arith.constant 0 : index
    %c0_7 = arith.constant 0 : index
    %8 = vector.load %arg6[%c0_6, %c0_7] : memref<8x128xf32, #tpu.memory_space<vmem>>, vector<8x128xf32>
    tpu.vector_store %arg6[%c0_6, %c0_7], %7 {strides = array<i32>} : memref<8x128xf32, #tpu.memory_space<vmem>>, vector<8x128xf32>,
    %c0_i32_8 = arith.constant 0 : i32
    %9 = arith.cmpi eq, %arg2, %c0_i32_8 : i32
    %10 = arith.extui %9 : i1 to i32
    %c0_i32_9 = arith.constant 0 : i32
    %11 = arith.cmpi ne, %10, %c0_i32_9 : i32
    scf.if %11 {
      %c0_10 = arith.constant 0 : index
      %c0_11 = arith.constant 0 : index
      %12 = vector.load %arg6[%c0_10, %c0_11] : memref<8x128xf32, #tpu.memory_space<vmem>>, vector<8x128xf32>
      %c0_12 = arith.constant 0 : index
      %c0_13 = arith.constant 0 : index
      %13 = vector.load %arg5[%c0_12, %c0_13] : memref<1x128xf32, #tpu.memory_space<vmem>>, vector<1x128xf32>
      %14 = vector.broadcast %13 : vector<1x128xf32> to vector<8x128xf32>
      %15 = arith.addf %12, %14 : vector<8x128xf32>
      %cst_14 = arith.constant 0.000000e+00 : f32
      %16 = vector.broadcast %cst_14 : f32 to vector<8x128xf32>
      %17 = arith.maximumf %15, %16 : vector<8x128xf32>
      %c0_15 = arith.constant 0 : index
      %c0_16 = arith.constant 0 : index
      %18 = vector.load %arg6[%c0_15, %c0_16] : memref<8x128xf32, #tpu.memory_space<vmem>>, vector<8x128xf32>
      tpu.vector_store %arg6[%c0_15, %c0_16], %17 {strides = array<i32>} : memref<8x128xf32, #tpu.memory_space<vmem>>, vector<8x128xf32>,
    } else {
    }
    return
  }
  func.func @transform_0(%arg0: i32, %arg1: i32, %arg2: i32) -> (i32, i32) {
    %c0_i32 = arith.constant 0 : i32
    return %arg0, %arg2 : i32, i32
  }
  func.func @transform_1(%arg0: i32, %arg1: i32, %arg2: i32) -> (i32, i32) {
    %c0_i32 = arith.constant 0 : i32
    return %arg2, %arg1 : i32, i32
  }
  func.func @transform_2(%arg0: i32, %arg1: i32, %arg2: i32) -> (i32, i32) {
    %c0_i32 = arith.constant 0 : i32
    %c0_i32_0 = arith.constant 0 : i32
    return %c0_i32, %arg1 : i32, i32
  }
  func.func @transform_3(%arg0: i32, %arg1: i32, %arg2: i32) -> (i32, i32) {
    %c0_i32 = arith.constant 0 : i32
    return %arg0, %arg1 : i32, i32
  }
}

</mosaic_0001>

<bundles_post_ra>
// kernel: tpu_custom_call.1
= control target key start
LH: loop header
LB: loop body
LE: loop exit
PB: predicated region body
PF: predicated region fallthrough
CT: control target
= control target key end

     0   :  { %8 = vsyncpa [#allocation3], 0  ;;  %s336_s0 = inlined_call_operand.hbm [shape: f32[8,32], index: 0, kind: input, shape index: {}]   ;;  %s337_s1 = inlined_call_operand.hbm [shape: f32[32,128], index: 1, kind: input, shape index: {}]   ;;  %s338_s2 = inlined_call_operand.vmem [shape: f32[1,128], index: 2, kind: input, shape index: {}]   ;;  %s339_s3 = inlined_call_operand.hbm [shape: f32[8,128], index: 3, kind: output, shape index: {}]  }
   0x1   :  { %9 = vsyncpa [#allocation6], 0 }
   0x2   :  { %10 = vsyncpa [#allocation4], 0  ;;  %s262_s12 = smov [#allocation2]   ;;  %s263_s14 = smov [#allocation5]  }
   0x3   :  { %s17_s13 = sshll.u32 %s262_s12, 4  ;;  %s26_s15 = sshll.u32 %s263_s14, 4  ;;  %s18_s13 = int_to_ptr.vmem [resolvable:$true] %s17_s13  ;;  %s290_s15 = int_to_ptr.vmem [resolvable:$true] %s26_s15 }
   0x4   :  { %s190_s18 = scalar_lea.hbm %s336_s0, 128 }
   0x5   :  { %p191_p0 = scmp.ne.s32.totalorder %s336_s0, %s190_s18  ;;  %p194_p1 = scmp.lt.u32.totalorder %s190_s18, %s336_s0 }
   0x7   :  { %p196_p2 = pnand %p194_p1, %p191_p0 }
   0x9   :  { %199 = shalt.err (!%p196_p2)
}
   0xa   :  { %s200_s23 = scalar_lea.vmem %s18_s13, 128  ;;  %p205_p4 = scmp.lt.s32.totalorder %s18_s13, %s18_s13 }
   0xb   :  { %p201_p3 = scmp.ne.s32.totalorder %s18_s13, %s200_s23  ;;  %p206_p5 = scmp.lt.s32.totalorder %s200_s23, %s200_s23 }
   0xd   :  { %p207_p6 = por %p206_p5, %p205_p4 }
   0xf   :  { %p208_p7 = pnand %p207_p6, %p201_p3 }
  0x11   :  { %211 = shalt.err (!%p208_p7)
}
  0x12   :  { %20 = dma.hbm_to_vmem [thread:$0]  %s336_s0, 128, %s18_s13, [#allocation3]  }
  0x13   :  { %s212_s28 = scalar_lea.hbm %s337_s1, 512 }
  0x14   :  { %p213_p8 = scmp.ne.s32.totalorder %s337_s1, %s212_s28  ;;  %p216_p9 = scmp.lt.u32.totalorder %s212_s28, %s337_s1 }
  0x16   :  { %p218_p10 = pnand %p216_p9, %p213_p8 }
  0x18   :  { %221 = shalt.err (!%p218_p10)
}
  0x19   :  { %s222_s6 = scalar_lea.vmem %s290_s15, 512  ;;  %p227_p12 = scmp.lt.s32.totalorder %s290_s15, %s290_s15 }
  0x1a   :  { %p223_p11 = scmp.ne.s32.totalorder %s290_s15, %s222_s6  ;;  %p228_p13 = scmp.lt.s32.totalorder %s222_s6, %s222_s6 }
  0x1c   :  { %p229_p0 = por %p228_p13, %p227_p12 }
  0x1e   :  { %p230_p1 = pnand %p229_p0, %p223_p11 }
  0x20   :  { %233 = shalt.err (!%p230_p1)
}
  0x21   :  { %s264_s0 = smov 128   ;;  %s265_s7 = smov 8  }
  0x22   :  { %32 = dma.hbm_to_vmem [thread:$0]  %s337_s1, 512, %s290_s15, [#allocation6], %s264_s0, %s264_s0, %s265_s7  }
  0x23   :  { %256 = dma.done.wait [#allocation3], 128  }
  0x24   :  { %257 = vsyncadd [#allocation3], 4294967168 }
  0x25   :  { %258 = dma.done.wait [#allocation6], 512  }
  0x26   :  { %259 = vsyncadd [#allocation6], 4294966784  ;;  %v266_v0 = vmov 0.0|0.0   ;;  %vm267_vm0 = vmmov 0   ;;  %v268_v1 = vmov 0.0   ;;  %v48_v2 = vld [vmem:[#allocation5] sm:$0xff] }
  0x27   :  { %176 = vmatprep.subr.bf16.mxu0 %v266_v0  ;;  %173 = vmatprep.mubr.msk.f32.mxu0 %vm267_vm0, %v268_v1  ;;  %v49_v3 = vld [vmem:[#allocation5 + $0x8] sm:$0xff]  ;;  %v50_v4 = vld [vmem:[#allocation5 + $0x10] sm:$0xff]  ;;  %v51_v6 = vld [vmem:[#allocation5 + $0x18] sm:$0xff]  ;;  %vm52_vm1 = vcmask 261120   ;;  %s269_s11 = smov [#allocation7]  }
  0x28   :  { %v177_v5 = vpack.c.bf16 %v49_v3, %v48_v2  ;;  %v180_v7 = vpack.c.bf16 %v51_v6, %v50_v4  ;;  %v47_v8 = vld [vmem:[#allocation2] sm:$0xff]  ;;  %s148_s12 = sshll.u32 %s269_s11, 4  ;;  %s149_s12 = int_to_ptr.vmem [resolvable:$true] %s148_s12 }
  0x29   :  { %v159_v10 = vld [vmem:[%s338_s2] ss:$0 sm:$0xff]  ;;  %s234_s13 = scalar_lea.vmem %s149_s12, 128  ;;  %p239_p3 = scmp.lt.s32.totalorder %s149_s12, %s149_s12 }
  0x2a   :  { %178 = vmatpush3.bf16.msra.mxu0 %v177_v5  ;;  %p235_p2 = scmp.ne.s32.totalorder %s149_s12, %s234_s13  ;;  %p240_p4 = scmp.lt.s32.totalorder %s234_s13, %s234_s13 }
  0x2b   :  { %179 = vmatprep.subr.bf16.mxu0 %v266_v0 }
  0x2c   :  { %p241_p5 = por %p240_p4, %p239_p3 }
  0x2e   :  { %181 = vmatpush3.bf16.msra.mxu0 %v180_v7  ;;  %p242_p6 = pnand %p241_p5, %p235_p2 }
  0x31   :  { %174 = vmatmul.mubr.msk.f32.vlgmr.msra.gmra.mrb[0].mxu0 %vm52_vm1, %v47_v8 }
 0x104   :  { %v122_v9 = vpop.f32.mrb[0].mxu0 }
 0x105   :  { %v175_v11 = vpop.f32.mrb[1].mxu0  ;;  %v139_v12 = vadd.f32 %v159_v10, %v122_v9 }
 0x107   :  { %v140_v13 = vmax.f32 %v139_v12, 0.0 }
 0x109   :  { %141 = vst [vmem:[#allocation7] sm:$0xff] %v140_v13 }
 0x10a   :  { %245 = shalt.err (!%p242_p6)
}
 0x10b   :  { %s246_s16 = scalar_lea.hbm %s339_s3, 128 }
 0x10c   :  { %p247_p7 = scmp.ne.s32.totalorder %s339_s3, %s246_s16  ;;  %p250_p8 = scmp.lt.u32.totalorder %s246_s16, %s339_s3 }
 0x10e   :  { %p252_p9 = pnand %p250_p8, %p247_p7 }
 0x110   :  { %255 = shalt.err (!%p252_p9)
}
 0x111   :  { %151 = dma.vmem_to_hbm [thread:$0]  %s149_s12, 128, %s339_s3, [#allocation4]  }
 0x112   :  { %260 = dma.done.wait [#allocation4], 128  }
 0x113   :  { %261 = vsyncadd [#allocation4], 4294967168 }
 0x114   :  { %155 = vsyncpa [#allocation3], 1 }
 0x115   :  { %156 = vsyncpa [#allocation6], 1 }
 0x116   :  { %157 = vsyncpa [#allocation4], 1 }

</bundles_post_ra>
